<compile_context>
chip_gen: v7x
topology: tpu7x:2x2x1
jax: 0.10.0
libtpu: 0.0.40
codegen_flags: <defaults>
</compile_context>

<pallas_src>
import functools

import jax
import jax.numpy as jnp
from jax.experimental import pallas as pl
from jax.experimental.pallas import tpu as pltpu


# ----------------------------- Pallas kernel -----------------------------

def _kwm_kernel(T, B, H,
                x_ref,      # (T*B, 2D)   row t*B+b; cols = [x[t, b] | x[T-1-t, b]]
                wih_ref,    # (3, 2D, 2H) per-gate block-diag input weights (gates r, z, n)
                whh_ref,    # (3, 2H, 2H) per-gate block-diag recurrent weights
                bih_ref,    # (3, 1, 2H)
                bhh_ref,    # (3, 1, 2H)
                fcw_ref,    # (2H, latent) pre-transposed fc weight
                fcb_ref,    # (1, latent)
                out_ref):   # (B, latent)
    H2 = 2 * H
    x = x_ref[...]

    # --- hoisted input projection (off the serial h-chain), one matmul per gate ---
    gi_r = jnp.dot(x, wih_ref[0], preferred_element_type=jnp.float32) + bih_ref[0]
    gi_z = jnp.dot(x, wih_ref[1], preferred_element_type=jnp.float32) + bih_ref[1]
    gi_n = jnp.dot(x, wih_ref[2], preferred_element_type=jnp.float32) + bih_ref[2]

    w_r, w_z, w_n = whh_ref[0], whh_ref[1], whh_ref[2]
    b_r, b_z, b_n = bhh_ref[0], bhh_ref[1], bhh_ref[2]

    # --- fused bidirectional GRU recurrence, fully unrolled (T is small & static) ---
    h = jnp.zeros((B, H2), jnp.float32)
    acc = jnp.zeros((B, H2), jnp.float32)
    for t in range(T):
        lo, hi = t * B, (t + 1) * B
        gh_r = jnp.dot(h, w_r, preferred_element_type=jnp.float32) + b_r
        gh_z = jnp.dot(h, w_z, preferred_element_type=jnp.float32) + b_z
        gh_n = jnp.dot(h, w_n, preferred_element_type=jnp.float32) + b_n
        r = jax.nn.sigmoid(gi_r[lo:hi, :] + gh_r)
        z = jax.nn.sigmoid(gi_z[lo:hi, :] + gh_z)
        n = jnp.tanh(gi_n[lo:hi, :] + r * gh_n)      # b_hn stays inside r*(...) (PyTorch GRU semantics)
        h = (1.0 - z) * n + z * h
        acc = acc + h

    # --- temporal mean pool (= [mean_fwd | mean_bwd]) + Linear -----------------------
    feat = acc * (1.0 / T)
    out = jnp.dot(feat, fcw_ref[...], preferred_element_type=jnp.float32) + fcb_ref[...]
    out_ref[...] = out.astype(out_ref.dtype)


# ----------------------------- wrapper -----------------------------

def _gate(w, g, H):
    # PyTorch layout (3H, X), gate order r, z, n -> transposed gate block (X, H).
    return w[g * H:(g + 1) * H, :].T


def _block_diag(a, b):
    Da, Ha = a.shape
    Db, Hb = b.shape
    top = jnp.concatenate([a, jnp.zeros((Da, Hb), a.dtype)], axis=1)
    bot = jnp.concatenate([jnp.zeros((Db, Ha), b.dtype), b], axis=1)
    return jnp.concatenate([top, bot], axis=0)          # (Da+Db, Ha+Hb)


def knowledge_weighting_forward(x, params, max_length, latent_dim):
    """x: (B, N, D). Pads/truncates N to max_length, then runs the fused Pallas kernel."""
    B, N, D = x.shape
    T = max_length
    H = params["w_hh_f"].shape[1]

    # pad / truncate to max_length (matches the PyTorch forward; zeros contribute to the mean,
    # same as nn.GRU over the padded sequence).
    if N < T:
        x = jnp.concatenate([x, jnp.zeros((B, T - N, D), x.dtype)], axis=1)
    elif N > T:
        x = x[:, :T, :]

    # (B,T,D) -> (T,B,D); fused-direction input: step s sees [x[s] | x[T-1-s]].
    x_tb = jnp.transpose(x, (1, 0, 2)).astype(jnp.float32)
    x_cat = jnp.concatenate([x_tb, x_tb[::-1]], axis=-1)        # (T, B, 2D)
    x_flat = x_cat.reshape(T * B, 2 * D)

    # Per-gate block-diagonal (fwd (+) bwd) weights, pre-transposed for right-multiplication.
    wih = jnp.stack([_block_diag(_gate(params["w_ih_f"], g, H),
                                 _gate(params["w_ih_b"], g, H)) for g in range(3)])   # (3, 2D, 2H)
    whh = jnp.stack([_block_diag(_gate(params["w_hh_f"], g, H),
                                 _gate(params["w_hh_b"], g, H)) for g in range(3)])   # (3, 2H, 2H)

    def _bias(bf, bb, g):
        return jnp.concatenate([bf[0, g * H:(g + 1) * H],
                                bb[0, g * H:(g + 1) * H]])[None, :]                   # (1, 2H)

    bih = jnp.stack([_bias(params["b_ih_f"], params["b_ih_b"], g) for g in range(3)])  # (3, 1, 2H)
    bhh = jnp.stack([_bias(params["b_hh_f"], params["b_hh_b"], g) for g in range(3)])  # (3, 1, 2H)

    fcw_t = params["fc_w"].T            # (2H, latent)
    fcb = params["fc_b"]                # (1, latent)

    args = (x_flat, wih, whh, bih, bhh, fcw_t, fcb)
    vmem = pl.BlockSpec(memory_space=pltpu.MemorySpace.VMEM)
    kernel = functools.partial(_kwm_kernel, T, B, H)
    return pl.pallas_call(
        kernel,
        out_shape=jax.ShapeDtypeStruct((B, latent_dim), jnp.float32),
        in_specs=[vmem] * len(args),
        out_specs=vmem,
    )(*args)


# ----------------------------- pure-JAX reference -----------------------------

def _reference(x, params, max_length, latent_dim):
    B, N, D = x.shape
    if N < max_length:
        x = jnp.concatenate([x, jnp.zeros((B, max_length - N, D), x.dtype)], axis=1)
    elif N > max_length:
        x = x[:, :max_length, :]
    T = max_length
    H = params["w_hh_f"].shape[1]

    def run_dir(w_ih, w_hh, b_ih, b_hh, reverse):
        hs = []
        h = jnp.zeros((B, H), jnp.float32)
        ts = range(T - 1, -1, -1) if reverse else range(T)
        for t in ts:
            xt = x[:, t, :]
            gi = xt @ w_ih.T + b_ih
            gh = h @ w_hh.T + b_hh
            r = jax.nn.sigmoid(gi[:, :H] + gh[:, :H])
            z = jax.nn.sigmoid(gi[:, H:2 * H] + gh[:, H:2 * H])
            n = jnp.tanh(gi[:, 2 * H:] + r * gh[:, 2 * H:])
            h = (1.0 - z) * n + z * h
            hs.append(h)
        return sum(hs) / float(T)

    mf = run_dir(params["w_ih_f"], params["w_hh_f"], params["b_ih_f"], params["b_hh_f"], False)
    mb = run_dir(params["w_ih_b"], params["w_hh_b"], params["b_ih_b"], params["b_hh_b"], True)
    feat = jnp.concatenate([mf, mb], axis=-1)
    return feat @ params["fc_w"].T + params["fc_b"]


# ----------------------------- main -----------------------------

if __name__ == "__main__":
    # args: dataset != '50salads' -> latent_dim = 16; use_gsnn=True,
    # rectification_method='weighting' -> hidden_dim = latent_dim // 2 = 8,
    # vocab_size (max_length) = 8, context_dim = 32.
    vocab_size = 8        # max_length (T)
    context_dim = 32      # D
    latent_dim = 16
    hidden_dim = latent_dim // 2   # 8
    B, N = 2, 6                    # variable-length input (N < max_length -> exercises padding)

    key = jax.random.PRNGKey(0)
    keys = jax.random.split(key, 12)
    bound = 1.0 / jnp.sqrt(hidden_dim)

    def u(k, shape):
        return jax.random.uniform(k, shape, jnp.float32, -bound, bound)

    params = {
        # forward direction GRU params (PyTorch layout: (3H, D)/(3H, H), gate order r, z, n)
        "w_ih_f": u(keys[0], (3 * hidden_dim, context_dim)),
        "w_hh_f": u(keys[1], (3 * hidden_dim, hidden_dim)),
        "b_ih_f": u(keys[2], (1, 3 * hidden_dim)),
        "b_hh_f": u(keys[3], (1, 3 * hidden_dim)),
        # backward direction GRU params
        "w_ih_b": u(keys[4], (3 * hidden_dim, context_dim)),
        "w_hh_b": u(keys[5], (3 * hidden_dim, hidden_dim)),
        "b_ih_b": u(keys[6], (1, 3 * hidden_dim)),
        "b_hh_b": u(keys[7], (1, 3 * hidden_dim)),
        # fc: Linear(2*hidden_dim, latent_dim)
        "fc_w": u(keys[8], (latent_dim, 2 * hidden_dim)),
        "fc_b": u(keys[9], (1, latent_dim)),
    }

    x = jax.random.normal(keys[10], (B, N, context_dim), jnp.float32)

    out = knowledge_weighting_forward(x, params, vocab_size, latent_dim)
    out = jax.block_until_ready(out)

    ref = _reference(x, params, vocab_size, latent_dim)
    assert out.shape == (B, latent_dim)
    assert jnp.allclose(out, ref, rtol=2e-3, atol=2e-3), (out, ref)

    print("KERNEL_OK")
</pallas_src>

<mosaic_0001>
module attributes {stable_mosaic.version = 11 : i64} {
  func.func @_kwm_kernel(%arg0: memref<16x64xf32, #tpu.memory_space<vmem>>, %arg1: memref<3x64x16xf32, #tpu.memory_space<vmem>>, %arg2: memref<3x16x16xf32, #tpu.memory_space<vmem>>, %arg3: memref<3x1x16xf32, #tpu.memory_space<vmem>>, %arg4: memref<3x1x16xf32, #tpu.memory_space<vmem>>, %arg5: memref<16x16xf32, #tpu.memory_space<vmem>>, %arg6: memref<1x16xf32, #tpu.memory_space<vmem>>, %arg7: memref<2x16xf32, #tpu.memory_space<vmem>>) attributes {dimension_semantics = [], scalar_prefetch = 0 : i64, scratch_operands = 0 : i64, tpu.core_type = #tpu.core_type<tc>} {
    %c0 = arith.constant 0 : index
    %c0_0 = arith.constant 0 : index
    %0 = vector.load %arg0[%c0, %c0_0] : memref<16x64xf32, #tpu.memory_space<vmem>>, vector<16x64xf32>
    %c0_1 = arith.constant 0 : index
    %c0_2 = arith.constant 0 : index
    %c0_3 = arith.constant 0 : index
    %1 = vector.load %arg1[%c0_1, %c0_2, %c0_3] : memref<3x64x16xf32, #tpu.memory_space<vmem>>, vector<1x64x16xf32>
    %2 = vector.shape_cast %1 : vector<1x64x16xf32> to vector<64x16xf32>
    %cst = arith.constant dense<0.000000e+00> : vector<16x16xf32>
    %3 = tpu.matmul %0, %2, %cst {dimension_numbers = #tpu.dot_dimension_numbers<[1], [0], [0], [1], [0, 0, 1, 1], [], []>} : vector<16x64xf32>, vector<64x16xf32>, vector<16x16xf32> -> vector<16x16xf32>
    %c0_4 = arith.constant 0 : index
    %c0_5 = arith.constant 0 : index
    %c0_6 = arith.constant 0 : index
    %4 = vector.load %arg3[%c0_4, %c0_5, %c0_6] : memref<3x1x16xf32, #tpu.memory_space<vmem>>, vector<1x1x16xf32>
    %5 = vector.shape_cast %4 : vector<1x1x16xf32> to vector<1x16xf32>
    %6 = vector.broadcast %5 : vector<1x16xf32> to vector<16x16xf32>
    %7 = arith.addf %3, %6 : vector<16x16xf32>
    %c1 = arith.constant 1 : index
    %c0_7 = arith.constant 0 : index
    %c0_8 = arith.constant 0 : index
    %8 = vector.load %arg1[%c1, %c0_7, %c0_8] : memref<3x64x16xf32, #tpu.memory_space<vmem>>, vector<1x64x16xf32>
    %9 = vector.shape_cast %8 : vector<1x64x16xf32> to vector<64x16xf32>
    %cst_9 = arith.constant dense<0.000000e+00> : vector<16x16xf32>
    %10 = tpu.matmul %0, %9, %cst_9 {dimension_numbers = #tpu.dot_dimension_numbers<[1], [0], [0], [1], [0, 0, 1, 1], [], []>} : vector<16x64xf32>, vector<64x16xf32>, vector<16x16xf32> -> vector<16x16xf32>
    %c1_10 = arith.constant 1 : index
    %c0_11 = arith.constant 0 : index
    %c0_12 = arith.constant 0 : index
    %11 = vector.load %arg3[%c1_10, %c0_11, %c0_12] : memref<3x1x16xf32, #tpu.memory_space<vmem>>, vector<1x1x16xf32>
    %12 = vector.shape_cast %11 : vector<1x1x16xf32> to vector<1x16xf32>
    %13 = vector.broadcast %12 : vector<1x16xf32> to vector<16x16xf32>
    %14 = arith.addf %10, %13 : vector<16x16xf32>
    %c2 = arith.constant 2 : index
    %c0_13 = arith.constant 0 : index
    %c0_14 = arith.constant 0 : index
    %15 = vector.load %arg1[%c2, %c0_13, %c0_14] : memref<3x64x16xf32, #tpu.memory_space<vmem>>, vector<1x64x16xf32>
    %16 = vector.shape_cast %15 : vector<1x64x16xf32> to vector<64x16xf32>
    %cst_15 = arith.constant dense<0.000000e+00> : vector<16x16xf32>
    %17 = tpu.matmul %0, %16, %cst_15 {dimension_numbers = #tpu.dot_dimension_numbers<[1], [0], [0], [1], [0, 0, 1, 1], [], []>} : vector<16x64xf32>, vector<64x16xf32>, vector<16x16xf32> -> vector<16x16xf32>
    %c2_16 = arith.constant 2 : index
    %c0_17 = arith.constant 0 : index
    %c0_18 = arith.constant 0 : index
    %18 = vector.load %arg3[%c2_16, %c0_17, %c0_18] : memref<3x1x16xf32, #tpu.memory_space<vmem>>, vector<1x1x16xf32>
    %19 = vector.shape_cast %18 : vector<1x1x16xf32> to vector<1x16xf32>
    %20 = vector.broadcast %19 : vector<1x16xf32> to vector<16x16xf32>
    %21 = arith.addf %17, %20 : vector<16x16xf32>
    %c0_19 = arith.constant 0 : index
    %c0_20 = arith.constant 0 : index
    %c0_21 = arith.constant 0 : index
    %22 = vector.load %arg2[%c0_19, %c0_20, %c0_21] : memref<3x16x16xf32, #tpu.memory_space<vmem>>, vector<1x16x16xf32>
    %23 = vector.shape_cast %22 : vector<1x16x16xf32> to vector<16x16xf32>
    %c1_22 = arith.constant 1 : index
    %c0_23 = arith.constant 0 : index
    %c0_24 = arith.constant 0 : index
    %24 = vector.load %arg2[%c1_22, %c0_23, %c0_24] : memref<3x16x16xf32, #tpu.memory_space<vmem>>, vector<1x16x16xf32>
    %25 = vector.shape_cast %24 : vector<1x16x16xf32> to vector<16x16xf32>
    %c2_25 = arith.constant 2 : index
    %c0_26 = arith.constant 0 : index
    %c0_27 = arith.constant 0 : index
    %26 = vector.load %arg2[%c2_25, %c0_26, %c0_27] : memref<3x16x16xf32, #tpu.memory_space<vmem>>, vector<1x16x16xf32>
    %27 = vector.shape_cast %26 : vector<1x16x16xf32> to vector<16x16xf32>
    %c0_28 = arith.constant 0 : index
    %c0_29 = arith.constant 0 : index
    %c0_30 = arith.constant 0 : index
    %28 = vector.load %arg4[%c0_28, %c0_29, %c0_30] : memref<3x1x16xf32, #tpu.memory_space<vmem>>, vector<1x1x16xf32>
    %29 = vector.shape_cast %28 : vector<1x1x16xf32> to vector<1x16xf32>
    %c1_31 = arith.constant 1 : index
    %c0_32 = arith.constant 0 : index
    %c0_33 = arith.constant 0 : index
    %30 = vector.load %arg4[%c1_31, %c0_32, %c0_33] : memref<3x1x16xf32, #tpu.memory_space<vmem>>, vector<1x1x16xf32>
    %31 = vector.shape_cast %30 : vector<1x1x16xf32> to vector<1x16xf32>
    %c2_34 = arith.constant 2 : index
    %c0_35 = arith.constant 0 : index
    %c0_36 = arith.constant 0 : index
    %32 = vector.load %arg4[%c2_34, %c0_35, %c0_36] : memref<3x1x16xf32, #tpu.memory_space<vmem>>, vector<1x1x16xf32>
    %33 = vector.shape_cast %32 : vector<1x1x16xf32> to vector<1x16xf32>
    %cst_37 = arith.constant 0.000000e+00 : f32
    %34 = vector.broadcast %cst_37 : f32 to vector<2x16xf32>
    %cst_38 = arith.constant 0.000000e+00 : f32
    %35 = vector.broadcast %cst_38 : f32 to vector<2x16xf32>
    %cst_39 = arith.constant dense<0.000000e+00> : vector<2x16xf32>
    %36 = tpu.matmul %34, %23, %cst_39 {dimension_numbers = #tpu.dot_dimension_numbers<[1], [0], [0], [1], [0, 0, 1, 1], [], []>} : vector<2x16xf32>, vector<16x16xf32>, vector<2x16xf32> -> vector<2x16xf32>
    %37 = vector.broadcast %29 : vector<1x16xf32> to vector<2x16xf32>
    %38 = arith.addf %36, %37 : vector<2x16xf32>
    %cst_40 = arith.constant dense<0.000000e+00> : vector<2x16xf32>
    %39 = tpu.matmul %34, %25, %cst_40 {dimension_numbers = #tpu.dot_dimension_numbers<[1], [0], [0], [1], [0, 0, 1, 1], [], []>} : vector<2x16xf32>, vector<16x16xf32>, vector<2x16xf32> -> vector<2x16xf32>
    %40 = vector.broadcast %31 : vector<1x16xf32> to vector<2x16xf32>
    %41 = arith.addf %39, %40 : vector<2x16xf32>
    %cst_41 = arith.constant dense<0.000000e+00> : vector<2x16xf32>
    %42 = tpu.matmul %34, %27, %cst_41 {dimension_numbers = #tpu.dot_dimension_numbers<[1], [0], [0], [1], [0, 0, 1, 1], [], []>} : vector<2x16xf32>, vector<16x16xf32>, vector<2x16xf32> -> vector<2x16xf32>
    %43 = vector.broadcast %33 : vector<1x16xf32> to vector<2x16xf32>
    %44 = arith.addf %42, %43 : vector<2x16xf32>
    %45 = vector.extract_strided_slice %7 {offsets = [0, 0], sizes = [2, 16], strides = [1, 1]} : vector<16x16xf32> to vector<2x16xf32>
    %46 = arith.addf %45, %38 : vector<2x16xf32>
    %47 = arith.negf %46 : vector<2x16xf32>
    %48 = math.exp %47 : vector<2x16xf32>
    %cst_42 = arith.constant 1.000000e+00 : f32
    %49 = vector.broadcast %cst_42 : f32 to vector<2x16xf32>
    %50 = arith.addf %49, %48 : vector<2x16xf32>
    %51 = arith.divf %49, %50 : vector<2x16xf32>
    %52 = vector.extract_strided_slice %14 {offsets = [0, 0], sizes = [2, 16], strides = [1, 1]} : vector<16x16xf32> to vector<2x16xf32>
    %53 = arith.addf %52, %41 : vector<2x16xf32>
    %54 = arith.negf %53 : vector<2x16xf32>
    %55 = math.exp %54 : vector<2x16xf32>
    %cst_43 = arith.constant 1.000000e+00 : f32
    %56 = vector.broadcast %cst_43 : f32 to vector<2x16xf32>
    %57 = arith.addf %56, %55 : vector<2x16xf32>
    %58 = arith.divf %56, %57 : vector<2x16xf32>
    %59 = vector.extract_strided_slice %21 {offsets = [0, 0], sizes = [2, 16], strides = [1, 1]} : vector<16x16xf32> to vector<2x16xf32>
    %60 = arith.mulf %51, %44 : vector<2x16xf32>
    %61 = arith.addf %59, %60 : vector<2x16xf32>
    %62 = math.tanh %61 : vector<2x16xf32>
    %cst_44 = arith.constant 1.000000e+00 : f32
    %63 = vector.broadcast %cst_44 : f32 to vector<2x16xf32>
    %64 = arith.subf %63, %58 : vector<2x16xf32>
    %65 = arith.mulf %64, %62 : vector<2x16xf32>
    %66 = arith.mulf %58, %34 : vector<2x16xf32>
    %67 = arith.addf %65, %66 : vector<2x16xf32>
    %68 = arith.addf %35, %67 : vector<2x16xf32>
    %cst_45 = arith.constant dense<0.000000e+00> : vector<2x16xf32>
    %69 = tpu.matmul %67, %23, %cst_45 {dimension_numbers = #tpu.dot_dimension_numbers<[1], [0], [0], [1], [0, 0, 1, 1], [], []>} : vector<2x16xf32>, vector<16x16xf32>, vector<2x16xf32> -> vector<2x16xf32>
    %70 = vector.broadcast %29 : vector<1x16xf32> to vector<2x16xf32>
    %71 = arith.addf %69, %70 : vector<2x16xf32>
    %cst_46 = arith.constant dense<0.000000e+00> : vector<2x16xf32>
    %72 = tpu.matmul %67, %25, %cst_46 {dimension_numbers = #tpu.dot_dimension_numbers<[1], [0], [0], [1], [0, 0, 1, 1], [], []>} : vector<2x16xf32>, vector<16x16xf32>, vector<2x16xf32> -> vector<2x16xf32>
    %73 = vector.broadcast %31 : vector<1x16xf32> to vector<2x16xf32>
    %74 = arith.addf %72, %73 : vector<2x16xf32>
    %cst_47 = arith.constant dense<0.000000e+00> : vector<2x16xf32>
    %75 = tpu.matmul %67, %27, %cst_47 {dimension_numbers = #tpu.dot_dimension_numbers<[1], [0], [0], [1], [0, 0, 1, 1], [], []>} : vector<2x16xf32>, vector<16x16xf32>, vector<2x16xf32> -> vector<2x16xf32>
    %76 = vector.broadcast %33 : vector<1x16xf32> to vector<2x16xf32>
    %77 = arith.addf %75, %76 : vector<2x16xf32>
    %78 = vector.extract_strided_slice %7 {offsets = [2, 0], sizes = [2, 16], strides = [1, 1]} : vector<16x16xf32> to vector<2x16xf32>
    %79 = arith.addf %78, %71 : vector<2x16xf32>
    %80 = arith.negf %79 : vector<2x16xf32>
    %81 = math.exp %80 : vector<2x16xf32>
    %cst_48 = arith.constant 1.000000e+00 : f32
    %82 = vector.broadcast %cst_48 : f32 to vector<2x16xf32>
    %83 = arith.addf %82, %81 : vector<2x16xf32>
    %84 = arith.divf %82, %83 : vector<2x16xf32>
    %85 = vector.extract_strided_slice %14 {offsets = [2, 0], sizes = [2, 16], strides = [1, 1]} : vector<16x16xf32> to vector<2x16xf32>
    %86 = arith.addf %85, %74 : vector<2x16xf32>
    %87 = arith.negf %86 : vector<2x16xf32>
    %88 = math.exp %87 : vector<2x16xf32>
    %cst_49 = arith.constant 1.000000e+00 : f32
    %89 = vector.broadcast %cst_49 : f32 to vector<2x16xf32>
    %90 = arith.addf %89, %88 : vector<2x16xf32>
    %91 = arith.divf %89, %90 : vector<2x16xf32>
    %92 = vector.extract_strided_slice %21 {offsets = [2, 0], sizes = [2, 16], strides = [1, 1]} : vector<16x16xf32> to vector<2x16xf32>
    %93 = arith.mulf %84, %77 : vector<2x16xf32>
    %94 = arith.addf %92, %93 : vector<2x16xf32>
    %95 = math.tanh %94 : vector<2x16xf32>
    %cst_50 = arith.constant 1.000000e+00 : f32
    %96 = vector.broadcast %cst_50 : f32 to vector<2x16xf32>
    %97 = arith.subf %96, %91 : vector<2x16xf32>
    %98 = arith.mulf %97, %95 : vector<2x16xf32>
    %99 = arith.mulf %91, %67 : vector<2x16xf32>
    %100 = arith.addf %98, %99 : vector<2x16xf32>
    %101 = arith.addf %68, %100 : vector<2x16xf32>
    %cst_51 = arith.constant dense<0.000000e+00> : vector<2x16xf32>
    %102 = tpu.matmul %100, %23, %cst_51 {dimension_numbers = #tpu.dot_dimension_numbers<[1], [0], [0], [1], [0, 0, 1, 1], [], []>} : vector<2x16xf32>, vector<16x16xf32>, vector<2x16xf32> -> vector<2x16xf32>
    %103 = vector.broadcast %29 : vector<1x16xf32> to vector<2x16xf32>
    %104 = arith.addf %102, %103 : vector<2x16xf32>
    %cst_52 = arith.constant dense<0.000000e+00> : vector<2x16xf32>
    %105 = tpu.matmul %100, %25, %cst_52 {dimension_numbers = #tpu.dot_dimension_numbers<[1], [0], [0], [1], [0, 0, 1, 1], [], []>} : vector<2x16xf32>, vector<16x16xf32>, vector<2x16xf32> -> vector<2x16xf32>
    %106 = vector.broadcast %31 : vector<1x16xf32> to vector<2x16xf32>
    %107 = arith.addf %105, %106 : vector<2x16xf32>
    %cst_53 = arith.constant dense<0.000000e+00> : vector<2x16xf32>
    %108 = tpu.matmul %100, %27, %cst_53 {dimension_numbers = #tpu.dot_dimension_numbers<[1], [0], [0], [1], [0, 0, 1, 1], [], []>} : vector<2x16xf32>, vector<16x16xf32>, vector<2x16xf32> -> vector<2x16xf32>
    %109 = vector.broadcast %33 : vector<1x16xf32> to vector<2x16xf32>
    %110 = arith.addf %108, %109 : vector<2x16xf32>
    %111 = vector.extract_strided_slice %7 {offsets = [4, 0], sizes = [2, 16], strides = [1, 1]} : vector<16x16xf32> to vector<2x16xf32>
    %112 = arith.addf %111, %104 : vector<2x16xf32>
    %113 = arith.negf %112 : vector<2x16xf32>
    %114 = math.exp %113 : vector<2x16xf32>
    %cst_54 = arith.constant 1.000000e+00 : f32
    %115 = vector.broadcast %cst_54 : f32 to vector<2x16xf32>
    %116 = arith.addf %115, %114 : vector<2x16xf32>
    %117 = arith.divf %115, %116 : vector<2x16xf32>
    %118 = vector.extract_strided_slice %14 {offsets = [4, 0], sizes = [2, 16], strides = [1, 1]} : vector<16x16xf32> to vector<2x16xf32>
    %119 = arith.addf %118, %107 : vector<2x16xf32>
    %120 = arith.negf %119 : vector<2x16xf32>
    %121 = math.exp %120 : vector<2x16xf32>
    %cst_55 = arith.constant 1.000000e+00 : f32
    %122 = vector.broadcast %cst_55 : f32 to vector<2x16xf32>
    %123 = arith.addf %122, %121 : vector<2x16xf32>
    %124 = arith.divf %122, %123 : vector<2x16xf32>
    %125 = vector.extract_strided_slice %21 {offsets = [4, 0], sizes = [2, 16], strides = [1, 1]} : vector<16x16xf32> to vector<2x16xf32>
    %126 = arith.mulf %117, %110 : vector<2x16xf32>
    %127 = arith.addf %125, %126 : vector<2x16xf32>
    %128 = math.tanh %127 : vector<2x16xf32>
    %cst_56 = arith.constant 1.000000e+00 : f32
    %129 = vector.broadcast %cst_56 : f32 to vector<2x16xf32>
    %130 = arith.subf %129, %124 : vector<2x16xf32>
    %131 = arith.mulf %130, %128 : vector<2x16xf32>
    %132 = arith.mulf %124, %100 : vector<2x16xf32>
    %133 = arith.addf %131, %132 : vector<2x16xf32>
    %134 = arith.addf %101, %133 : vector<2x16xf32>
    %cst_57 = arith.constant dense<0.000000e+00> : vector<2x16xf32>
    %135 = tpu.matmul %133, %23, %cst_57 {dimension_numbers = #tpu.dot_dimension_numbers<[1], [0], [0], [1], [0, 0, 1, 1], [], []>} : vector<2x16xf32>, vector<16x16xf32>, vector<2x16xf32> -> vector<2x16xf32>
    %136 = vector.broadcast %29 : vector<1x16xf32> to vector<2x16xf32>
    %137 = arith.addf %135, %136 : vector<2x16xf32>
    %cst_58 = arith.constant dense<0.000000e+00> : vector<2x16xf32>
    %138 = tpu.matmul %133, %25, %cst_58 {dimension_numbers = #tpu.dot_dimension_numbers<[1], [0], [0], [1], [0, 0, 1, 1], [], []>} : vector<2x16xf32>, vector<16x16xf32>, vector<2x16xf32> -> vector<2x16xf32>
    %139 = vector.broadcast %31 : vector<1x16xf32> to vector<2x16xf32>
    %140 = arith.addf %138, %139 : vector<2x16xf32>
    %cst_59 = arith.constant dense<0.000000e+00> : vector<2x16xf32>
    %141 = tpu.matmul %133, %27, %cst_59 {dimension_numbers = #tpu.dot_dimension_numbers<[1], [0], [0], [1], [0, 0, 1, 1], [], []>} : vector<2x16xf32>, vector<16x16xf32>, vector<2x16xf32> -> vector<2x16xf32>
    %142 = vector.broadcast %33 : vector<1x16xf32> to vector<2x16xf32>
    %143 = arith.addf %141, %142 : vector<2x16xf32>
    %144 = vector.extract_strided_slice %7 {offsets = [6, 0], sizes = [2, 16], strides = [1, 1]} : vector<16x16xf32> to vector<2x16xf32>
    %145 = arith.addf %144, %137 : vector<2x16xf32>
    %146 = arith.negf %145 : vector<2x16xf32>
    %147 = math.exp %146 : vector<2x16xf32>
    %cst_60 = arith.constant 1.000000e+00 : f32
    %148 = vector.broadcast %cst_60 : f32 to vector<2x16xf32>
    %149 = arith.addf %148, %147 : vector<2x16xf32>
    %150 = arith.divf %148, %149 : vector<2x16xf32>
    %151 = vector.extract_strided_slice %14 {offsets = [6, 0], sizes = [2, 16], strides = [1, 1]} : vector<16x16xf32> to vector<2x16xf32>
    %152 = arith.addf %151, %140 : vector<2x16xf32>
    %153 = arith.negf %152 : vector<2x16xf32>
    %154 = math.exp %153 : vector<2x16xf32>
    %cst_61 = arith.constant 1.000000e+00 : f32
    %155 = vector.broadcast %cst_61 : f32 to vector<2x16xf32>
    %156 = arith.addf %155, %154 : vector<2x16xf32>
    %157 = arith.divf %155, %156 : vector<2x16xf32>
    %158 = vector.extract_strided_slice %21 {offsets = [6, 0], sizes = [2, 16], strides = [1, 1]} : vector<16x16xf32> to vector<2x16xf32>
    %159 = arith.mulf %150, %143 : vector<2x16xf32>
    %160 = arith.addf %158, %159 : vector<2x16xf32>
    %161 = math.tanh %160 : vector<2x16xf32>
    %cst_62 = arith.constant 1.000000e+00 : f32
    %162 = vector.broadcast %cst_62 : f32 to vector<2x16xf32>
    %163 = arith.subf %162, %157 : vector<2x16xf32>
    %164 = arith.mulf %163, %161 : vector<2x16xf32>
    %165 = arith.mulf %157, %133 : vector<2x16xf32>
    %166 = arith.addf %164, %165 : vector<2x16xf32>
    %167 = arith.addf %134, %166 : vector<2x16xf32>
    %cst_63 = arith.constant dense<0.000000e+00> : vector<2x16xf32>
    %168 = tpu.matmul %166, %23, %cst_63 {dimension_numbers = #tpu.dot_dimension_numbers<[1], [0], [0], [1], [0, 0, 1, 1], [], []>} : vector<2x16xf32>, vector<16x16xf32>, vector<2x16xf32> -> vector<2x16xf32>
    %169 = vector.broadcast %29 : vector<1x16xf32> to vector<2x16xf32>
    %170 = arith.addf %168, %169 : vector<2x16xf32>
    %cst_64 = arith.constant dense<0.000000e+00> : vector<2x16xf32>
    %171 = tpu.matmul %166, %25, %cst_64 {dimension_numbers = #tpu.dot_dimension_numbers<[1], [0], [0], [1], [0, 0, 1, 1], [], []>} : vector<2x16xf32>, vector<16x16xf32>, vector<2x16xf32> -> vector<2x16xf32>
    %172 = vector.broadcast %31 : vector<1x16xf32> to vector<2x16xf32>
    %173 = arith.addf %171, %172 : vector<2x16xf32>
    %cst_65 = arith.constant dense<0.000000e+00> : vector<2x16xf32>
    %174 = tpu.matmul %166, %27, %cst_65 {dimension_numbers = #tpu.dot_dimension_numbers<[1], [0], [0], [1], [0, 0, 1, 1], [], []>} : vector<2x16xf32>, vector<16x16xf32>, vector<2x16xf32> -> vector<2x16xf32>
    %175 = vector.broadcast %33 : vector<1x16xf32> to vector<2x16xf32>
    %176 = arith.addf %174, %175 : vector<2x16xf32>
    %177 = vector.extract_strided_slice %7 {offsets = [8, 0], sizes = [2, 16], strides = [1, 1]} : vector<16x16xf32> to vector<2x16xf32>
    %178 = arith.addf %177, %170 : vector<2x16xf32>
    %179 = arith.negf %178 : vector<2x16xf32>
    %180 = math.exp %179 : vector<2x16xf32>
    %cst_66 = arith.constant 1.000000e+00 : f32
    %181 = vector.broadcast %cst_66 : f32 to vector<2x16xf32>
    %182 = arith.addf %181, %180 : vector<2x16xf32>
    %183 = arith.divf %181, %182 : vector<2x16xf32>
    %184 = vector.extract_strided_slice %14 {offsets = [8, 0], sizes = [2, 16], strides = [1, 1]} : vector<16x16xf32> to vector<2x16xf32>
    %185 = arith.addf %184, %173 : vector<2x16xf32>
    %186 = arith.negf %185 : vector<2x16xf32>
    %187 = math.exp %186 : vector<2x16xf32>
    %cst_67 = arith.constant 1.000000e+00 : f32
    %188 = vector.broadcast %cst_67 : f32 to vector<2x16xf32>
    %189 = arith.addf %188, %187 : vector<2x16xf32>
    %190 = arith.divf %188, %189 : vector<2x16xf32>
    %191 = vector.extract_strided_slice %21 {offsets = [8, 0], sizes = [2, 16], strides = [1, 1]} : vector<16x16xf32> to vector<2x16xf32>
    %192 = arith.mulf %183, %176 : vector<2x16xf32>
    %193 = arith.addf %191, %192 : vector<2x16xf32>
    %194 = math.tanh %193 : vector<2x16xf32>
    %cst_68 = arith.constant 1.000000e+00 : f32
    %195 = vector.broadcast %cst_68 : f32 to vector<2x16xf32>
    %196 = arith.subf %195, %190 : vector<2x16xf32>
    %197 = arith.mulf %196, %194 : vector<2x16xf32>
    %198 = arith.mulf %190, %166 : vector<2x16xf32>
    %199 = arith.addf %197, %198 : vector<2x16xf32>
    %200 = arith.addf %167, %199 : vector<2x16xf32>
    %cst_69 = arith.constant dense<0.000000e+00> : vector<2x16xf32>
    %201 = tpu.matmul %199, %23, %cst_69 {dimension_numbers = #tpu.dot_dimension_numbers<[1], [0], [0], [1], [0, 0, 1, 1], [], []>} : vector<2x16xf32>, vector<16x16xf32>, vector<2x16xf32> -> vector<2x16xf32>
    %202 = vector.broadcast %29 : vector<1x16xf32> to vector<2x16xf32>
    %203 = arith.addf %201, %202 : vector<2x16xf32>
    %cst_70 = arith.constant dense<0.000000e+00> : vector<2x16xf32>
    %204 = tpu.matmul %199, %25, %cst_70 {dimension_numbers = #tpu.dot_dimension_numbers<[1], [0], [0], [1], [0, 0, 1, 1], [], []>} : vector<2x16xf32>, vector<16x16xf32>, vector<2x16xf32> -> vector<2x16xf32>
    %205 = vector.broadcast %31 : vector<1x16xf32> to vector<2x16xf32>
    %206 = arith.addf %204, %205 : vector<2x16xf32>
    %cst_71 = arith.constant dense<0.000000e+00> : vector<2x16xf32>
    %207 = tpu.matmul %199, %27, %cst_71 {dimension_numbers = #tpu.dot_dimension_numbers<[1], [0], [0], [1], [0, 0, 1, 1], [], []>} : vector<2x16xf32>, vector<16x16xf32>, vector<2x16xf32> -> vector<2x16xf32>
    %208 = vector.broadcast %33 : vector<1x16xf32> to vector<2x16xf32>
    %209 = arith.addf %207, %208 : vector<2x16xf32>
    %210 = vector.extract_strided_slice %7 {offsets = [10, 0], sizes = [2, 16], strides = [1, 1]} : vector<16x16xf32> to vector<2x16xf32>
    %211 = arith.addf %210, %203 : vector<2x16xf32>
    %212 = arith.negf %211 : vector<2x16xf32>
    %213 = math.exp %212 : vector<2x16xf32>
    %cst_72 = arith.constant 1.000000e+00 : f32
    %214 = vector.broadcast %cst_72 : f32 to vector<2x16xf32>
    %215 = arith.addf %214, %213 : vector<2x16xf32>
    %216 = arith.divf %214, %215 : vector<2x16xf32>
    %217 = vector.extract_strided_slice %14 {offsets = [10, 0], sizes = [2, 16], strides = [1, 1]} : vector<16x16xf32> to vector<2x16xf32>
    %218 = arith.addf %217, %206 : vector<2x16xf32>
    %219 = arith.negf %218 : vector<2x16xf32>
    %220 = math.exp %219 : vector<2x16xf32>
    %cst_73 = arith.constant 1.000000e+00 : f32
    %221 = vector.broadcast %cst_73 : f32 to vector<2x16xf32>
    %222 = arith.addf %221, %220 : vector<2x16xf32>
    %223 = arith.divf %221, %222 : vector<2x16xf32>
    %224 = vector.extract_strided_slice %21 {offsets = [10, 0], sizes = [2, 16], strides = [1, 1]} : vector<16x16xf32> to vector<2x16xf32>
    %225 = arith.mulf %216, %209 : vector<2x16xf32>
    %226 = arith.addf %224, %225 : vector<2x16xf32>
    %227 = math.tanh %226 : vector<2x16xf32>
    %cst_74 = arith.constant 1.000000e+00 : f32
    %228 = vector.broadcast %cst_74 : f32 to vector<2x16xf32>
    %229 = arith.subf %228, %223 : vector<2x16xf32>
    %230 = arith.mulf %229, %227 : vector<2x16xf32>
    %231 = arith.mulf %223, %199 : vector<2x16xf32>
    %232 = arith.addf %230, %231 : vector<2x16xf32>
    %233 = arith.addf %200, %232 : vector<2x16xf32>
    %cst_75 = arith.constant dense<0.000000e+00> : vector<2x16xf32>
    %234 = tpu.matmul %232, %23, %cst_75 {dimension_numbers = #tpu.dot_dimension_numbers<[1], [0], [0], [1], [0, 0, 1, 1], [], []>} : vector<2x16xf32>, vector<16x16xf32>, vector<2x16xf32> -> vector<2x16xf32>
    %235 = vector.broadcast %29 : vector<1x16xf32> to vector<2x16xf32>
    %236 = arith.addf %234, %235 : vector<2x16xf32>
    %cst_76 = arith.constant dense<0.000000e+00> : vector<2x16xf32>
    %237 = tpu.matmul %232, %25, %cst_76 {dimension_numbers = #tpu.dot_dimension_numbers<[1], [0], [0], [1], [0, 0, 1, 1], [], []>} : vector<2x16xf32>, vector<16x16xf32>, vector<2x16xf32> -> vector<2x16xf32>
    %238 = vector.broadcast %31 : vector<1x16xf32> to vector<2x16xf32>
    %239 = arith.addf %237, %238 : vector<2x16xf32>
    %cst_77 = arith.constant dense<0.000000e+00> : vector<2x16xf32>
    %240 = tpu.matmul %232, %27, %cst_77 {dimension_numbers = #tpu.dot_dimension_numbers<[1], [0], [0], [1], [0, 0, 1, 1], [], []>} : vector<2x16xf32>, vector<16x16xf32>, vector<2x16xf32> -> vector<2x16xf32>
    %241 = vector.broadcast %33 : vector<1x16xf32> to vector<2x16xf32>
    %242 = arith.addf %240, %241 : vector<2x16xf32>
    %243 = vector.extract_strided_slice %7 {offsets = [12, 0], sizes = [2, 16], strides = [1, 1]} : vector<16x16xf32> to vector<2x16xf32>
    %244 = arith.addf %243, %236 : vector<2x16xf32>
    %245 = arith.negf %244 : vector<2x16xf32>
    %246 = math.exp %245 : vector<2x16xf32>
    %cst_78 = arith.constant 1.000000e+00 : f32
    %247 = vector.broadcast %cst_78 : f32 to vector<2x16xf32>
    %248 = arith.addf %247, %246 : vector<2x16xf32>
    %249 = arith.divf %247, %248 : vector<2x16xf32>
    %250 = vector.extract_strided_slice %14 {offsets = [12, 0], sizes = [2, 16], strides = [1, 1]} : vector<16x16xf32> to vector<2x16xf32>
    %251 = arith.addf %250, %239 : vector<2x16xf32>
    %252 = arith.negf %251 : vector<2x16xf32>
    %253 = math.exp %252 : vector<2x16xf32>
    %cst_79 = arith.constant 1.000000e+00 : f32
    %254 = vector.broadcast %cst_79 : f32 to vector<2x16xf32>
    %255 = arith.addf %254, %253 : vector<2x16xf32>
    %256 = arith.divf %254, %255 : vector<2x16xf32>
    %257 = vector.extract_strided_slice %21 {offsets = [12, 0], sizes = [2, 16], strides = [1, 1]} : vector<16x16xf32> to vector<2x16xf32>
    %258 = arith.mulf %249, %242 : vector<2x16xf32>
    %259 = arith.addf %257, %258 : vector<2x16xf32>
    %260 = math.tanh %259 : vector<2x16xf32>
    %cst_80 = arith.constant 1.000000e+00 : f32
    %261 = vector.broadcast %cst_80 : f32 to vector<2x16xf32>
    %262 = arith.subf %261, %256 : vector<2x16xf32>
    %263 = arith.mulf %262, %260 : vector<2x16xf32>
    %264 = arith.mulf %256, %232 : vector<2x16xf32>
    %265 = arith.addf %263, %264 : vector<2x16xf32>
    %266 = arith.addf %233, %265 : vector<2x16xf32>
    %cst_81 = arith.constant dense<0.000000e+00> : vector<2x16xf32>
    %267 = tpu.matmul %265, %23, %cst_81 {dimension_numbers = #tpu.dot_dimension_numbers<[1], [0], [0], [1], [0, 0, 1, 1], [], []>} : vector<2x16xf32>, vector<16x16xf32>, vector<2x16xf32> -> vector<2x16xf32>
    %268 = vector.broadcast %29 : vector<1x16xf32> to vector<2x16xf32>
    %269 = arith.addf %267, %268 : vector<2x16xf32>
    %cst_82 = arith.constant dense<0.000000e+00> : vector<2x16xf32>
    %270 = tpu.matmul %265, %25, %cst_82 {dimension_numbers = #tpu.dot_dimension_numbers<[1], [0], [0], [1], [0, 0, 1, 1], [], []>} : vector<2x16xf32>, vector<16x16xf32>, vector<2x16xf32> -> vector<2x16xf32>
    %271 = vector.broadcast %31 : vector<1x16xf32> to vector<2x16xf32>
    %272 = arith.addf %270, %271 : vector<2x16xf32>
    %cst_83 = arith.constant dense<0.000000e+00> : vector<2x16xf32>
    %273 = tpu.matmul %265, %27, %cst_83 {dimension_numbers = #tpu.dot_dimension_numbers<[1], [0], [0], [1], [0, 0, 1, 1], [], []>} : vector<2x16xf32>, vector<16x16xf32>, vector<2x16xf32> -> vector<2x16xf32>
    %274 = vector.broadcast %33 : vector<1x16xf32> to vector<2x16xf32>
    %275 = arith.addf %273, %274 : vector<2x16xf32>
    %276 = vector.extract_strided_slice %7 {offsets = [14, 0], sizes = [2, 16], strides = [1, 1]} : vector<16x16xf32> to vector<2x16xf32>
    %277 = arith.addf %276, %269 : vector<2x16xf32>
    %278 = arith.negf %277 : vector<2x16xf32>
    %279 = math.exp %278 : vector<2x16xf32>
    %cst_84 = arith.constant 1.000000e+00 : f32
    %280 = vector.broadcast %cst_84 : f32 to vector<2x16xf32>
    %281 = arith.addf %280, %279 : vector<2x16xf32>
    %282 = arith.divf %280, %281 : vector<2x16xf32>
    %283 = vector.extract_strided_slice %14 {offsets = [14, 0], sizes = [2, 16], strides = [1, 1]} : vector<16x16xf32> to vector<2x16xf32>
    %284 = arith.addf %283, %272 : vector<2x16xf32>
    %285 = arith.negf %284 : vector<2x16xf32>
    %286 = math.exp %285 : vector<2x16xf32>
    %cst_85 = arith.constant 1.000000e+00 : f32
    %287 = vector.broadcast %cst_85 : f32 to vector<2x16xf32>
    %288 = arith.addf %287, %286 : vector<2x16xf32>
    %289 = arith.divf %287, %288 : vector<2x16xf32>
    %290 = vector.extract_strided_slice %21 {offsets = [14, 0], sizes = [2, 16], strides = [1, 1]} : vector<16x16xf32> to vector<2x16xf32>
    %291 = arith.mulf %282, %275 : vector<2x16xf32>
    %292 = arith.addf %290, %291 : vector<2x16xf32>
    %293 = math.tanh %292 : vector<2x16xf32>
    %cst_86 = arith.constant 1.000000e+00 : f32
    %294 = vector.broadcast %cst_86 : f32 to vector<2x16xf32>
    %295 = arith.subf %294, %289 : vector<2x16xf32>
    %296 = arith.mulf %295, %293 : vector<2x16xf32>
    %297 = arith.mulf %289, %265 : vector<2x16xf32>
    %298 = arith.addf %296, %297 : vector<2x16xf32>
    %299 = arith.addf %266, %298 : vector<2x16xf32>
    %cst_87 = arith.constant 1.250000e-01 : f32
    %300 = vector.broadcast %cst_87 : f32 to vector<2x16xf32>
    %301 = arith.mulf %299, %300 : vector<2x16xf32>
    %c0_88 = arith.constant 0 : index
    %c0_89 = arith.constant 0 : index
    %302 = vector.load %arg5[%c0_88, %c0_89] : memref<16x16xf32, #tpu.memory_space<vmem>>, vector<16x16xf32>
    %cst_90 = arith.constant dense<0.000000e+00> : vector<2x16xf32>
    %303 = tpu.matmul %301, %302, %cst_90 {dimension_numbers = #tpu.dot_dimension_numbers<[1], [0], [0], [1], [0, 0, 1, 1], [], []>} : vector<2x16xf32>, vector<16x16xf32>, vector<2x16xf32> -> vector<2x16xf32>
    %c0_91 = arith.constant 0 : index
    %c0_92 = arith.constant 0 : index
    %304 = vector.load %arg6[%c0_91, %c0_92] : memref<1x16xf32, #tpu.memory_space<vmem>>, vector<1x16xf32>
    %305 = vector.broadcast %304 : vector<1x16xf32> to vector<2x16xf32>
    %306 = arith.addf %303, %305 : vector<2x16xf32>
    %c0_93 = arith.constant 0 : index
    %c0_94 = arith.constant 0 : index
    %307 = vector.load %arg7[%c0_93, %c0_94] : memref<2x16xf32, #tpu.memory_space<vmem>>, vector<2x16xf32>
    tpu.vector_store %arg7[%c0_93, %c0_94], %306 {strides = array<i32>} : memref<2x16xf32, #tpu.memory_space<vmem>>, vector<2x16xf32>,
    return
  }
}

</mosaic_0001>

<bundles_post_ra>
// kernel: tpu_custom_call.1
= control target key start
LH: loop header
LB: loop body
LE: loop exit
PB: predicated region body
PF: predicated region fallthrough
CT: control target
= control target key end

     0   :  { %vm44_vm0 = vcmask 523264   ;;  %s3434_s0 = inlined_call_operand.vmem [shape: f32[16,64], index: 0, kind: input, shape index: {}]   ;;  %s3435_s1 = inlined_call_operand.vmem [shape: f32[3,64,16], index: 1, kind: input, shape index: {}]   ;;  %s3436_s2 = inlined_call_operand.vmem [shape: f32[3,16,16], index: 2, kind: input, shape index: {}]   ;;  %s3437_s3 = inlined_call_operand.vmem [shape: f32[3,1,16], index: 3, kind: input, shape index: {}]   ;;  %s3438_s4 = inlined_call_operand.vmem [shape: f32[3,1,16], index: 4, kind: input, shape index: {}]   ;;  %s3439_s5 = inlined_call_operand.vmem [shape: f32[16,16], index: 5, kind: input, shape index: {}]   ;;  %s3440_s6 = inlined_call_operand.vmem [shape: f32[1,16], index: 6, kind: input, shape index: {}]   ;;  %s3441_s7 = inlined_call_operand.hbm [shape: f32[2,16], index: 7, kind: output, shape index: {}]  }
   0x1   :  { %v2403_v0 = vld [vmem:[%s3435_s1 + $0x40] sm:$0xff]  ;;  %v2404_v1 = vld [vmem:[%s3435_s1 + $0x48] sm:$0xff]  ;;  %v2405_v5 = vld [vmem:[%s3435_s1 + $0x50] sm:$0xff] }
   0x2   :  { %v29_v2 = vld [vmem:[%s3435_s1] sm:$0xff]  ;;  %v2828_v3 = vpack.c.bf16 %v2404_v1, %v2403_v0  ;;  %v30_v4 = vld [vmem:[%s3435_s1 + $0x8] sm:$0xff]  ;;  %v2406_v6 = vld [vmem:[%s3435_s1 + $0x58] sm:$0xff] }
   0x3   :  { %v2812_v7 = vpack.c.bf16 %v30_v4, %v29_v2  ;;  %v2832_v8 = vpack.c.bf16 %v2406_v6, %v2405_v5  ;;  %v31_v9 = vld [vmem:[%s3435_s1 + $0x10] sm:$0xff]  ;;  %v32_v10 = vld [vmem:[%s3435_s1 + $0x18] sm:$0xff]  ;;  %v2407_v11 = vld [vmem:[%s3435_s1 + $0x60] sm:$0xff] }
   0x4   :  { %2829 = vmatprep.subr.bf16.mxu1 %v2828_v3  ;;  %v2816_v12 = vpack.c.bf16 %v32_v10, %v31_v9  ;;  %v2408_v13 = vld [vmem:[%s3435_s1 + $0x68] sm:$0xff]  ;;  %v33_v14 = vld [vmem:[%s3435_s1 + $0x20] sm:$0xff]  ;;  %v2409_v19 = vld [vmem:[%s3435_s1 + $0x70] sm:$0xff] }
   0x5   :  { %v34_v15 = vld [vmem:[%s3435_s1 + $0x28] sm:$0xff]  ;;  %2831 = vmatpush3.bf16.msra.mxu1 %v2828_v3  ;;  %2813 = vmatprep.subr.bf16.mxu0 %v2812_v7  ;;  %v2836_v16 = vpack.c.bf16 %v2408_v13, %v2407_v11  ;;  %v27_v17 = vld [vmem:[%s3434_s0] sm:$0xff]  ;;  %v2410_v20 = vld [vmem:[%s3435_s1 + $0x78] sm:$0xff] }
   0x6   :  { %2815 = vmatpush3.bf16.msra.mxu0 %v2812_v7  ;;  %2833 = vmatprep.subr.bf16.mxu1 %v2832_v8  ;;  %v2820_v18 = vpack.c.bf16 %v34_v15, %v33_v14  ;;  %v35_v21 = vld [vmem:[%s3435_s1 + $0x30] sm:$0xff]  ;;  %v36_v22 = vld [vmem:[%s3435_s1 + $0x38] sm:$0xff]  ;;  %v2840_v23 = vpack.c.bf16 %v2410_v20, %v2409_v19 }
   0x7   :  { %2817 = vmatprep.subr.bf16.mxu0 %v2816_v12  ;;  %2615 = vmatprep.mubr.msk.f32.mxu1 %vm44_vm0, %v27_v17  ;;  %v2824_v24 = vpack.c.bf16 %v36_v22, %v35_v21 }
   0x8   :  { %2596 = vmatprep.mubr.msk.f32.mxu0 %vm44_vm0, %v27_v17 }
   0x9   :  { %2835 = vmatpush3.bf16.msra.mxu1 %v2832_v8 }
   0xa   :  { %2819 = vmatpush3.bf16.msra.mxu0 %v2816_v12  ;;  %2837 = vmatprep.subr.bf16.mxu1 %v2836_v16 }
   0xb   :  { %2821 = vmatprep.subr.bf16.mxu0 %v2820_v18 }
   0xc   :  { %12 = vsyncpa [#allocation3], 0  ;;  %v2415_v25 = vld [vmem:[%s3435_s1 + $0x80] sm:$0xff]  ;;  %v2416_v26 = vld [vmem:[%s3435_s1 + $0x88] sm:$0xff]  ;;  %v3043_v34 = vmov 0.0|0.0   ;;  %vm3044_vm1 = vmmov 0  }
   0xd   :  { %2839 = vmatpush3.bf16.msra.mxu1 %v2836_v16  ;;  %v310_v27 = vld [vmem:[%s3436_s2] sm:$0xff]  ;;  %v311_v28 = vld [vmem:[%s3436_s2 + $0x8] sm:$0xff]  ;;  %v2844_v29 = vpack.c.bf16 %v2416_v26, %v2415_v25  ;;  %v2417_v32 = vld [vmem:[%s3435_s1 + $0x90] sm:$0xff]  ;;  %v3045_v41 = vmov 0.0   ;;  %vm329_vm2 = vcmask 130048   ;;  %s3046_s30 = smov [#allocation2]  }
   0xe   :  { %2823 = vmatpush3.bf16.msra.mxu0 %v2820_v18  ;;  %2841 = vmatprep.subr.bf16.mxu1 %v2840_v23  ;;  %v28_v30 = vld [vmem:[%s3434_s0 + $0x8] sm:$0xff]  ;;  %v3155_v31 = vpack.c.bf16 %v311_v28, %v310_v27  ;;  %v2418_v33 = vld [vmem:[%s3435_s1 + $0x98] sm:$0xff]  ;;  %v2427_v35 = vld [vmem:[%s3436_s2 + $0x10] sm:$0xff]  ;;  %s2392_s8 = sshll.u32 %s3046_s30, 4  ;;  %vm2384_vm3 = vcmask 123904   ;;  %s2393_s8 = int_to_ptr.vmem [resolvable:$true] %s2392_s8 }
   0xf   :  { %2825 = vmatprep.subr.bf16.mxu0 %v2824_v24  ;;  %v2428_v36 = vld [vmem:[%s3436_s2 + $0x18] sm:$0xff]  ;;  %v2848_v37 = vpack.c.bf16 %v2418_v33, %v2417_v32  ;;  %v2419_v39 = vld [vmem:[%s3435_s1 + $0xa0] sm:$0xff]  ;;  %v2420_v40 = vld [vmem:[%s3435_s1 + $0xa8] sm:$0xff]  ;;  %s3019_s9 = scalar_lea.vmem %s2393_s8, 32  ;;  %p3024_p1 = scmp.lt.s32.totalorder %s2393_s8, %s2393_s8 }
  0x10   :  { %v3173_v38 = vpack.c.bf16 %v2428_v36, %v2427_v35  ;;  %v2429_v42 = vld [vmem:[%s3436_s2 + $0x20] sm:$0xff]  ;;  %v2430_v43 = vld [vmem:[%s3436_s2 + $0x28] sm:$0xff]  ;;  %v2852_v44 = vpack.c.bf16 %v2420_v40, %v2419_v39  ;;  %v2421_v45 = vld [vmem:[%s3435_s1 + $0xb0] sm:$0xff]  ;;  %p3020_p0 = scmp.ne.s32.totalorder %s2393_s8, %s3019_s9  ;;  %p3025_p2 = scmp.lt.s32.totalorder %s3019_s9, %s3019_s9 }
  0x11   :  { %2843 = vmatpush3.bf16.msra.mxu1 %v2840_v23  ;;  %v2422_v46 = vld [vmem:[%s3435_s1 + $0xb8] sm:$0xff]  ;;  %v3201_v47 = vpack.c.bf16 %v2430_v43, %v2429_v42  ;;  %v2412_v49 = vld [vmem:[%s3437_s3 + $0x1] ss:$0 sm:$0xff]  ;;  %v2400_v50 = vld [vmem:[%s3437_s3] ss:$0 sm:$0xff] }
  0x12   :  { %2827 = vmatpush3.bf16.msra.mxu0 %v2824_v24  ;;  %2860 = vmatprep.subr.bf16.mxu1 %v3043_v34  ;;  %v2856_v48 = vpack.c.bf16 %v2422_v46, %v2421_v45  ;;  %v3233_v57 = vld [vmem:[%s3438_s4] ss:$0 sm:$0xff]  ;;  %v3241_v62 = vld [vmem:[%s3438_s4 + $0x1] ss:$0 sm:$0xff]  ;;  %v2424_v9 = vld [vmem:[%s3437_s3 + $0x2] ss:$0 sm:$0xff]  ;;  %p3026_p3 = por %p3025_p2, %p3024_p1 }
  0x13   :  { %2845 = vmatprep.subr.bf16.mxu0 %v2844_v29  ;;  %v3256_v16 = vld [vmem:[%s3438_s4 + $0x2] ss:$0 sm:$0xff] }
  0x14   :  { %2616 = vmatmul.mubr.msk.f32.vlgmr.msra.gmra.mrb[0].mxu1 %vm44_vm0, %v28_v30  ;;  %p3027_p4 = pnand %p3026_p3, %p3020_p0 }
  0x15   :  { %2862 = vmatpush3.bf16.msra.mxu1 %v3155_v31  ;;  %2597 = vmatmul.mubr.msk.f32.vlgmr.msra.gmra.mrb[0].mxu0 %vm44_vm0, %v28_v30 }
  0x16   :  { %2641 = vmatprep.mubr.msk.f32.mxu1 %vm3044_vm1, %v3045_v41  ;;  %2863 = vmatprep.subr.bf16.mxu1 %v3043_v34 }
  0x17   :  { %2847 = vmatpush3.bf16.msra.mxu0 %v2844_v29  ;;  %2634 = vmatprep.mubr.msk.f32.mxu0 %vm44_vm0, %v27_v17 }
  0x18   :  { %2642 = vmatmul.mubr.f32.vlgmr.msra.gmra.mrb[2].mxu1 %v3045_v41  ;;  %2849 = vmatprep.subr.bf16.mxu0 %v2848_v37 }
  0x19   :  { %2865 = vmatpush3.bf16.msra.mxu1 %v3173_v38  ;;  %2648 = vmatprep.mubr.msk.f32.mxu1 %vm3044_vm1, %v3045_v41 }
  0x1a   :  { %2866 = vmatprep.subr.bf16.mxu1 %v3043_v34 }
  0x1b   :  { %2851 = vmatpush3.bf16.msra.mxu0 %v2848_v37 }
  0x1c   :  { %2649 = vmatmul.mubr.f32.vlgmr.msra.gmra.mrb[4].mxu1 %v3045_v41  ;;  %2853 = vmatprep.subr.bf16.mxu0 %v2852_v44 }
  0x1d   :  { %2868 = vmatpush3.bf16.msra.mxu1 %v3201_v47  ;;  %2655 = vmatprep.mubr.msk.f32.mxu1 %vm3044_vm1, %v3045_v41 }
  0x1e   :  { %2869 = vmatprep.subr.bf16.mxu1 %v3043_v34 }
  0x1f   :  { %2855 = vmatpush3.bf16.msra.mxu0 %v2852_v44 }
  0x20   :  { %2857 = vmatprep.subr.bf16.mxu0 %v2856_v48  ;;  %2656 = vmatmul.mubr.f32.vlgmr.msra.gmra.mrb[6].mxu1 %v3045_v41 }
  0x21   :  { %2871 = vmatpush3.bf16.msra.mxu1 %v3155_v31  ;;  %2662 = vmatprep.mubr.msk.f32.mxu1 %vm3044_vm1, %v3045_v41 }
  0x22   :  { %2875 = vmatprep.subr.bf16.mxu1 %v3043_v34 }
  0x23   :  { %2859 = vmatpush3.bf16.msra.mxu0 %v2856_v48 }
  0x24   :  { %2872 = vmatprep.subr.bf16.mxu0 %v3043_v34 }
  0x26   :  { %2635 = vmatmul.mubr.msk.f32.vlgmr.msra.gmra.mrb[2].mxu0 %vm44_vm0, %v28_v30 }
  0x27   :  { %2874 = vmatpush3.bf16.msra.mxu0 %v3173_v38  ;;  %2669 = vmatprep.mubr.msk.f32.mxu0 %vm3044_vm1, %v3045_v41 }
  0x28   :  { %2878 = vmatprep.subr.bf16.mxu0 %v3043_v34 }
  0xe7   :  { %v2617_v51 = vpop.f32.mrb[0].mxu1 }
  0xe8   :  { %v3226_v52 = vadd.f32 %v2617_v51, %v2412_v49  ;;  %v209_v53 = vpop.f32.mrb[1].mxu1  ;;  %v2598_v54 = vpop.f32.mrb[0].mxu0 }
  0xe9   :  { %v3228_v55 = vadd.f32 %v2598_v54, %v2400_v50  ;;  %v117_v56 = vpop.f32.mrb[1].mxu0  ;;  %v3244_v1 = vadd.f32 %v2412_v49, %v209_v53 }
  0xea   :  { %v3235_v58 = vadd.f32 %v2400_v50, %v117_v56 }
  0xeb   :  { %v399_v59 = vpop.f32.mrb[2].mxu1 }
  0xec   :  { %v400_v60 = vadd.f32 %v3233_v57, %v399_v59  ;;  %v2643_v61 = vpop.f32.mrb[3].mxu1 }
  0xee   :  { %v555_v63 = vadd.f32 %v400_v60, %v3235_v58 }
  0xef   :  { %v475_v0 = vpop.f32.mrb[4].mxu1 }
  0xf0   :  { %v2436_v2 = vmul.f32 -1.442695, %v555_v63  ;;  %v476_v3 = vadd.f32 %v3241_v62, %v475_v0  ;;  %v2650_v4 = vpop.f32.mrb[5].mxu1 }
  0xf2   :  { %2939 = vpow2.f32 %v2436_v2  ;;  %v562_v5 = vadd.f32 %v476_v3, %v3244_v1 }
  0xf3   :  { %v551_v6 = vpop.f32.mrb[6].mxu1 }
  0xf4   :  { %v2657_v7 = vpop.f32.mrb[7].mxu1  ;;  %v2437_v8 = vmul.f32 -1.442695, %v562_v5  ;;  %v552_v18 = vadd.f32 %v3256_v16, %v551_v6 }
  0xf6   :  { %2941 = vpow2.f32 %v2437_v8 }
  0xf9   :  { %v2636_v10 = vpop.f32.mrb[2].mxu0 }
  0xfa   :  { %v3251_v11 = vadd.f32 %v2636_v10, %v2424_v9  ;;  %v301_v12 = vpop.f32.mrb[3].mxu0 }
  0xfb   :  { %v3259_v19 = vadd.f32 %v2424_v9, %v301_v12 }
  0xfc   :  { %v2940_v13 = vpop.eup %2939 }
  0xfd   :  { %v559_v14 = vadd.f32 1.0, %v2940_v13 }
  0xff   :  { %2943 = vrcp.f32 %v559_v14 }
 0x100   :  { %v2942_v15 = vpop.eup %2941 }
 0x101   :  { %v566_v17 = vadd.f32 1.0, %v2942_v15 }
 0x103   :  { %2945 = vrcp.f32 %v566_v17 }
 0x109   :  { %v2944_v20 = vpop.eup %2943 }
 0x10a   :  { %v569_v21 = vmul.f32 %v2944_v20, %v552_v18 }
 0x10c   :  { %v570_v22 = vadd.f32 %v569_v21, %v3259_v19 }
 0x10d   :  { %v2946_v23 = vpop.eup %2945 }
 0x10e   :  { %2947 = vtanh.f32 %v570_v22  ;;  %v572_v24 = vsub.f32 1.0, %v2946_v23  ;;  %v574_v27 = vmul.f32 0.0, %v2946_v23 }
 0x118   :  { %v2948_v25 = vpop.eup %2947 }
 0x119   :  { %v573_v26 = vmul.f32 %v2948_v25, %v572_v24 }
 0x11b   :  { %v3262_v28 = vadd.f32 %v574_v27, %v573_v26 }
 0x11d   :  { %2663 = vmatmul.mubr.msk.f32.vlgmr.msra.gmra.mrb[8].mxu1 %vm329_vm2, %v3262_v28  ;;  %2670 = vmatmul.mubr.msk.f32.vlgmr.msra.gmra.mrb[4].mxu0 %vm329_vm2, %v3262_v28  ;;  %v818_v0 = vrot.slane %v3262_v28, 6 }
 0x11e   :  { %2877 = vmatpush3.bf16.msra.mxu1 %v3201_v47  ;;  %2676 = vmatprep.mubr.msk.f32.mxu1 %vm3044_vm1, %v3045_v41 }
 0x11f   :  { %2881 = vmatprep.subr.bf16.mxu1 %v3043_v34  ;;  %2880 = vmatpush3.bf16.msra.mxu0 %v3155_v31 }
 0x120   :  { %2683 = vmatprep.mubr.msk.f32.mxu0 %vm3044_vm1, %v3045_v41  ;;  %2884 = vmatprep.subr.bf16.mxu0 %v3043_v34 }
 0x121   :  { %2677 = vmatmul.mubr.msk.f32.vlgmr.msra.gmra.mrb[10].mxu1 %vm329_vm2, %v3262_v28 }
 0x122   :  { %2883 = vmatpush3.bf16.msra.mxu1 %v3173_v38  ;;  %2690 = vmatprep.mubr.msk.f32.mxu1 %vm3044_vm1, %v3045_v41 }
 0x123   :  { %2887 = vmatprep.subr.bf16.mxu1 %v3043_v34 }
 0x1f0   :  { %v646_v29 = vpop.f32.mrb[8].mxu1  ;;  %v716_v30 = vpop.f32.mrb[4].mxu0 }
 0x1f1   :  { %v647_v32 = vadd.f32 %v3233_v57, %v646_v29  ;;  %v717_v33 = vadd.f32 %v3241_v62, %v716_v30  ;;  %v2664_v35 = vpop.f32.mrb[9].mxu1  ;;  %v2671_v36 = vpop.f32.mrb[5].mxu0 }
 0x1f3   :  { %v791_v37 = vrot.slane %v647_v32, 6  ;;  %v801_v39 = vrot.slane %v717_v33, 6 }
 0x1f4   :  { %v786_v40 = vpop.f32.mrb[10].mxu1 }
 0x1f5   :  { %v793_v42 = vadd.f32 %v791_v37, %v3235_v58  ;;  %v2678_v43 = vpop.f32.mrb[11].mxu1  ;;  %v803_v45 = vadd.f32 %v801_v39, %v3244_v1  ;;  %v787_v51 = vadd.f32 %v3256_v16, %v786_v40 }
 0x1f7   :  { %v2441_v44 = vmul.f32 -1.442695, %v793_v42  ;;  %v2442_v46 = vmul.f32 -1.442695, %v803_v45  ;;  %v811_v54 = vrot.slane %v787_v51, 6 }
 0x1f9   :  { %2949 = vpow2.f32 %v2441_v44 }
 0x1fa   :  { %2951 = vpow2.f32 %v2442_v46 }
 0x203   :  { %v2950_v48 = vpop.eup %2949 }
 0x204   :  { %v797_v49 = vadd.f32 1.0, %v2950_v48  ;;  %v2952_v50 = vpop.eup %2951 }
 0x205   :  { %v807_v53 = vadd.f32 1.0, %v2952_v50 }
 0x206   :  { %2953 = vrcp.f32 %v797_v49 }
 0x207   :  { %2955 = vrcp.f32 %v807_v53 }
 0x210   :  { %v2954_v56 = vpop.eup %2953 }
 0x211   :  { %v813_v59 = vmul.f32 %v2954_v56, %v811_v54  ;;  %v2956_v61 = vpop.eup %2955 }
 0x212   :  { %v816_v63 = vsub.f32 1.0, %v2956_v61  ;;  %v820_v4 = vmul.f32 %v2956_v61, %v818_v0 }
 0x213   :  { %v814_v60 = vadd.f32 %v813_v59, %v3259_v19 }
 0x215   :  { %2957 = vtanh.f32 %v814_v60 }
 0x21f   :  { %v2958_v2 = vpop.eup %2957 }
 0x220   :  { %v817_v3 = vmul.f32 %v2958_v2, %v816_v63 }
 0x222   :  { %v821_v5 = vadd.f32 %v820_v4, %v817_v3 }
 0x224   :  { %v823_v6 = vrot.slane %v821_v5, 2  ;;  %v1066_v33 = vrot.slane %v821_v5, 6 }
 0x226   :  { %2684 = vmatmul.mubr.msk.f32.vlgmr.msra.gmra.mrb[6].mxu0 %vm329_vm2, %v823_v6  ;;  %2691 = vmatmul.mubr.msk.f32.vlgmr.msra.gmra.mrb[12].mxu1 %vm329_vm2, %v823_v6  ;;  %v825_v45 = vadd.f32 %v823_v6, %v3262_v28 }
 0x227   :  { %2886 = vmatpush3.bf16.msra.mxu0 %v3201_v47  ;;  %2697 = vmatprep.mubr.msk.f32.mxu0 %vm3044_vm1, %v3045_v41 }
 0x228   :  { %2890 = vmatprep.subr.bf16.mxu0 %v3043_v34  ;;  %2889 = vmatpush3.bf16.msra.mxu1 %v3155_v31 }
 0x229   :  { %2704 = vmatprep.mubr.msk.f32.mxu1 %vm3044_vm1, %v3045_v41  ;;  %2893 = vmatprep.subr.bf16.mxu1 %v3043_v34 }
 0x22a   :  { %2698 = vmatmul.mubr.msk.f32.vlgmr.msra.gmra.mrb[8].mxu0 %vm329_vm2, %v823_v6 }
 0x22b   :  { %2892 = vmatpush3.bf16.msra.mxu0 %v3173_v38  ;;  %2711 = vmatprep.mubr.msk.f32.mxu0 %vm3044_vm1, %v3045_v41 }
 0x22c   :  { %2896 = vmatprep.subr.bf16.mxu0 %v3043_v34 }
 0x2f9   :  { %v894_v7 = vpop.f32.mrb[6].mxu0  ;;  %v964_v8 = vpop.f32.mrb[12].mxu1 }
 0x2fa   :  { %v895_v9 = vadd.f32 %v3233_v57, %v894_v7  ;;  %v965_v10 = vadd.f32 %v3241_v62, %v964_v8  ;;  %v2685_v12 = vpop.f32.mrb[7].mxu0  ;;  %v2692_v13 = vpop.f32.mrb[13].mxu1 }
 0x2fc   :  { %v1039_v14 = vrot.slane %v895_v9, 4  ;;  %v1049_v15 = vrot.slane %v965_v10, 4 }
 0x2fd   :  { %v1034_v17 = vpop.f32.mrb[8].mxu0 }
 0x2fe   :  { %v1041_v18 = vadd.f32 %v1039_v14, %v3235_v58  ;;  %v1051_v20 = vadd.f32 %v1049_v15, %v3244_v1  ;;  %v2699_v21 = vpop.f32.mrb[9].mxu0  ;;  %v1035_v29 = vadd.f32 %v3256_v16, %v1034_v17 }
 0x300   :  { %v2446_v22 = vmul.f32 -1.442695, %v1041_v18  ;;  %v2447_v23 = vmul.f32 -1.442695, %v1051_v20  ;;  %v1059_v30 = vrot.slane %v1035_v29, 4 }
 0x302   :  { %2959 = vpow2.f32 %v2446_v22 }
 0x303   :  { %2961 = vpow2.f32 %v2447_v23 }
 0x30c   :  { %v2960_v24 = vpop.eup %2959 }
 0x30d   :  { %v2962_v25 = vpop.eup %2961  ;;  %v1045_v26 = vadd.f32 1.0, %v2960_v24 }
 0x30e   :  { %v1055_v27 = vadd.f32 1.0, %v2962_v25 }
 0x30f   :  { %2963 = vrcp.f32 %v1045_v26 }
 0x310   :  { %2965 = vrcp.f32 %v1055_v27 }
 0x319   :  { %v2964_v32 = vpop.eup %2963 }
 0x31a   :  { %v2966_v35 = vpop.eup %2965  ;;  %v1061_v36 = vmul.f32 %v2964_v32, %v1059_v30 }
 0x31b   :  { %v1068_v37 = vmul.f32 %v2966_v35, %v1066_v33  ;;  %v1064_v40 = vsub.f32 1.0, %v2966_v35 }
 0x31c   :  { %v1062_v39 = vadd.f32 %v1061_v36, %v3259_v19 }
 0x31e   :  { %2967 = vtanh.f32 %v1062_v39 }
 0x328   :  { %v2968_v42 = vpop.eup %2967 }
 0x329   :  { %v1065_v43 = vmul.f32 %v2968_v42, %v1064_v40 }
 0x32b   :  { %v1069_v44 = vadd.f32 %v1068_v37, %v1065_v43 }
 0x32d   :  { %v1071_v46 = vrot.slane %v1069_v44, 4  ;;  %v1314_v12 = vrot.slane %v1069_v44, 6 }
 0x32f   :  { %v3311_v48 = vadd.f32 %v1071_v46, %v825_v45  ;;  %2705 = vmatmul.mubr.msk.f32.vlgmr.msra.gmra.mrb[14].mxu1 %vm329_vm2, %v1071_v46  ;;  %2712 = vmatmul.mubr.msk.f32.vlgmr.msra.gmra.mrb[10].mxu0 %vm329_vm2, %v1071_v46 }
 0x330   :  { %2895 = vmatpush3.bf16.msra.mxu1 %v3201_v47  ;;  %2718 = vmatprep.mubr.msk.f32.mxu1 %vm3044_vm1, %v3045_v41 }
 0x331   :  { %2899 = vmatprep.subr.bf16.mxu1 %v3043_v34  ;;  %2898 = vmatpush3.bf16.msra.mxu0 %v3155_v31 }
 0x332   :  { %2725 = vmatprep.mubr.msk.f32.mxu0 %vm3044_vm1, %v3045_v41  ;;  %2902 = vmatprep.subr.bf16.mxu0 %v3043_v34 }
 0x333   :  { %2719 = vmatmul.mubr.msk.f32.vlgmr.msra.gmra.mrb[16].mxu1 %vm329_vm2, %v1071_v46 }
 0x334   :  { %2901 = vmatpush3.bf16.msra.mxu1 %v3173_v38  ;;  %2732 = vmatprep.mubr.msk.f32.mxu1 %vm3044_vm1, %v3045_v41 }
 0x335   :  { %2905 = vmatprep.subr.bf16.mxu1 %v3043_v34 }
 0x402   :  { %v1142_v28 = vpop.f32.mrb[14].mxu1  ;;  %v1212_v49 = vpop.f32.mrb[10].mxu0 }
 0x403   :  { %v1143_v50 = vadd.f32 %v3233_v57, %v1142_v28  ;;  %v1213_v51 = vadd.f32 %v3241_v62, %v1212_v49  ;;  %v2706_v53 = vpop.f32.mrb[15].mxu1  ;;  %v2713_v54 = vpop.f32.mrb[11].mxu0 }
 0x405   :  { %v1287_v56 = vrot.slane %v1143_v50, 2  ;;  %v1297_v59 = vrot.slane %v1213_v51, 2 }
 0x406   :  { %v1282_v60 = vpop.f32.mrb[16].mxu1 }
 0x407   :  { %v1289_v61 = vadd.f32 %v1287_v56, %v3235_v58  ;;  %v1299_v63 = vadd.f32 %v1297_v59, %v3244_v1  ;;  %v2720_v0 = vpop.f32.mrb[17].mxu1  ;;  %v1283_v8 = vadd.f32 %v3256_v16, %v1282_v60 }
 0x409   :  { %v2451_v2 = vmul.f32 -1.442695, %v1289_v61  ;;  %v2452_v3 = vmul.f32 -1.442695, %v1299_v63  ;;  %v1307_v9 = vrot.slane %v1283_v8, 2 }
 0x40b   :  { %2969 = vpow2.f32 %v2451_v2 }
 0x40c   :  { %2971 = vpow2.f32 %v2452_v3 }
 0x415   :  { %v2970_v4 = vpop.eup %2969 }
 0x416   :  { %v2972_v5 = vpop.eup %2971  ;;  %v1293_v6 = vadd.f32 1.0, %v2970_v4 }
 0x417   :  { %v1303_v7 = vadd.f32 1.0, %v2972_v5 }
 0x418   :  { %2973 = vrcp.f32 %v1293_v6 }
 0x419   :  { %2975 = vrcp.f32 %v1303_v7 }
 0x422   :  { %v2974_v10 = vpop.eup %2973 }
 0x423   :  { %v2976_v13 = vpop.eup %2975  ;;  %v1309_v58 = vmul.f32 %v2974_v10, %v1307_v9 }
 0x424   :  { %v1316_v14 = vmul.f32 %v2976_v13, %v1314_v12  ;;  %v1312_v15 = vsub.f32 1.0, %v2976_v13 }
 0x425   :  { %v1310_v1 = vadd.f32 %v1309_v58, %v3259_v19 }
 0x427   :  { %2977 = vtanh.f32 %v1310_v1 }
 0x431   :  { %v2978_v17 = vpop.eup %2977 }
 0x432   :  { %v1313_v18 = vmul.f32 %v2978_v17, %v1312_v15 }
 0x434   :  { %v1317_v20 = vadd.f32 %v1316_v14, %v1313_v18 }
 0x436   :  { %v1319_v21 = vrot.slane %v1317_v20, 6 }
 0x438   :  { %2726 = vmatmul.mubr.msk.f32.vlgmr.msra.gmra.mrb[12].mxu0 %vm329_vm2, %v1319_v21  ;;  %2733 = vmatmul.mubr.msk.f32.vlgmr.msra.gmra.mrb[18].mxu1 %vm329_vm2, %v1319_v21  ;;  %v1321_v54 = vadd.f32 %v1319_v21, %v3311_v48 }
 0x439   :  { %2904 = vmatpush3.bf16.msra.mxu0 %v3201_v47  ;;  %2739 = vmatprep.mubr.msk.f32.mxu0 %vm3044_vm1, %v3045_v41 }
 0x43a   :  { %2908 = vmatprep.subr.bf16.mxu0 %v3043_v34  ;;  %2907 = vmatpush3.bf16.msra.mxu1 %v3155_v31 }
 0x43b   :  { %2746 = vmatprep.mubr.msk.f32.mxu1 %vm3044_vm1, %v3045_v41  ;;  %2911 = vmatprep.subr.bf16.mxu1 %v3043_v34 }
 0x43c   :  { %2740 = vmatmul.mubr.msk.f32.vlgmr.msra.gmra.mrb[14].mxu0 %vm329_vm2, %v1319_v21 }
 0x43d   :  { %2910 = vmatpush3.bf16.msra.mxu0 %v3173_v38  ;;  %2753 = vmatprep.mubr.msk.f32.mxu0 %vm3044_vm1, %v3045_v41 }
 0x43e   :  { %2914 = vmatprep.subr.bf16.mxu0 %v3043_v34 }
 0x50b   :  { %v1390_v19 = vpop.f32.mrb[12].mxu0  ;;  %v1460_v22 = vpop.f32.mrb[18].mxu1 }
 0x50c   :  { %v1391_v23 = vadd.f32 %v3233_v57, %v1390_v19  ;;  %v2727_v24 = vpop.f32.mrb[13].mxu0  ;;  %v2734_v25 = vpop.f32.mrb[19].mxu1  ;;  %v1461_v26 = vadd.f32 %v3241_v62, %v1460_v22 }
 0x50e   :  { %v1534_v27 = vadd.f32 %v1391_v23, %v3228_v55  ;;  %v1541_v33 = vadd.f32 %v1461_v26, %v3226_v52 }
 0x50f   :  { %v1530_v29 = vpop.f32.mrb[14].mxu0 }
 0x510   :  { %v2456_v30 = vmul.f32 -1.442695, %v1534_v27  ;;  %v2741_v32 = vpop.f32.mrb[15].mxu0  ;;  %v2457_v35 = vmul.f32 -1.442695, %v1541_v33  ;;  %v1531_v42 = vadd.f32 %v3256_v16, %v1530_v29 }
 0x512   :  { %2979 = vpow2.f32 %v2456_v30 }
 0x513   :  { %2981 = vpow2.f32 %v2457_v35 }
 0x51c   :  { %v2980_v36 = vpop.eup %2979 }
 0x51d   :  { %v1538_v37 = vadd.f32 1.0, %v2980_v36  ;;  %v2982_v39 = vpop.eup %2981 }
 0x51e   :  { %v1545_v40 = vadd.f32 1.0, %v2982_v39 }
 0x51f   :  { %2983 = vrcp.f32 %v1538_v37 }
 0x520   :  { %2985 = vrcp.f32 %v1545_v40 }
 0x529   :  { %v2984_v43 = vpop.eup %2983 }
 0x52a   :  { %v1548_v44 = vmul.f32 %v2984_v43, %v1531_v42  ;;  %v2986_v46 = vpop.eup %2985 }
 0x52b   :  { %v1551_v28 = vsub.f32 1.0, %v2986_v46  ;;  %v1553_v51 = vmul.f32 %v2986_v46, %v1319_v21 }
 0x52c   :  { %v1549_v45 = vadd.f32 %v1548_v44, %v3251_v11 }
 0x52e   :  { %2987 = vtanh.f32 %v1549_v45 }
 0x538   :  { %v2988_v49 = vpop.eup %2987 }
 0x539   :  { %v1552_v50 = vmul.f32 %v2988_v49, %v1551_v28 }
 0x53b   :  { %v1554_v53 = vadd.f32 %v1553_v51, %v1552_v50 }
 0x53d   :  { %2747 = vmatmul.mubr.msk.f32.vlgmr.msra.gmra.mrb[20].mxu1 %vm329_vm2, %v1554_v53  ;;  %2754 = vmatmul.mubr.msk.f32.vlgmr.msra.gmra.mrb[16].mxu0 %vm329_vm2, %v1554_v53  ;;  %v1555_v56 = vadd.f32 %v1554_v53, %v1321_v54  ;;  %v1797_v17 = vrot.slane %v1554_v53, 6 }
 0x53e   :  { %2913 = vmatpush3.bf16.msra.mxu1 %v3201_v47  ;;  %2760 = vmatprep.mubr.msk.f32.mxu1 %vm3044_vm1, %v3045_v41 }
 0x53f   :  { %2917 = vmatprep.subr.bf16.mxu1 %v3043_v34  ;;  %2916 = vmatpush3.bf16.msra.mxu0 %v3155_v31 }
 0x540   :  { %2767 = vmatprep.mubr.msk.f32.mxu0 %vm3044_vm1, %v3045_v41  ;;  %2920 = vmatprep.subr.bf16.mxu0 %v3043_v34 }
 0x541   :  { %2761 = vmatmul.mubr.msk.f32.vlgmr.msra.gmra.mrb[22].mxu1 %vm329_vm2, %v1554_v53 }
 0x542   :  { %2919 = vmatpush3.bf16.msra.mxu1 %v3173_v38  ;;  %2774 = vmatprep.mubr.msk.f32.mxu1 %vm3044_vm1, %v3045_v41 }
 0x543   :  { %2923 = vmatprep.subr.bf16.mxu1 %v3043_v34 }
 0x610   :  { %v1625_v48 = vpop.f32.mrb[20].mxu1  ;;  %v1695_v59 = vpop.f32.mrb[16].mxu0 }
 0x611   :  { %v1626_v60 = vadd.f32 %v3233_v57, %v1625_v48  ;;  %v1696_v61 = vadd.f32 %v3241_v62, %v1695_v59  ;;  %v2748_v63 = vpop.f32.mrb[21].mxu1  ;;  %v2755_v0 = vpop.f32.mrb[17].mxu0 }
 0x613   :  { %v1770_v2 = vrot.slane %v1626_v60, 6  ;;  %v1780_v3 = vrot.slane %v1696_v61, 6 }
 0x614   :  { %v1765_v4 = vpop.f32.mrb[22].mxu1 }
 0x615   :  { %v1772_v5 = vadd.f32 %v1770_v2, %v3228_v55  ;;  %v1782_v6 = vadd.f32 %v1780_v3, %v3226_v52  ;;  %v2762_v7 = vpop.f32.mrb[23].mxu1  ;;  %v1766_v14 = vadd.f32 %v3256_v16, %v1765_v4  ;;  %v2302_v4 = vld [vmem:[%s3439_s5] sm:$0xff] }
 0x617   :  { %v2461_v8 = vmul.f32 -1.442695, %v1772_v5  ;;  %v2462_v9 = vmul.f32 -1.442695, %v1782_v6  ;;  %v1790_v1 = vrot.slane %v1766_v14, 6  ;;  %v2303_v5 = vld [vmem:[%s3439_s5 + $0x8] sm:$0xff] }
 0x618   :  { %v2933_v6 = vpack.c.bf16 %v2303_v5, %v2302_v4 }
 0x619   :  { %2989 = vpow2.f32 %v2461_v8 }
 0x61a   :  { %2991 = vpow2.f32 %v2462_v9 }
 0x623   :  { %v2990_v10 = vpop.eup %2989 }
 0x624   :  { %v2992_v12 = vpop.eup %2991  ;;  %v1776_v13 = vadd.f32 1.0, %v2990_v10 }
 0x625   :  { %v1786_v58 = vadd.f32 1.0, %v2992_v12 }
 0x626   :  { %2993 = vrcp.f32 %v1776_v13 }
 0x627   :  { %2995 = vrcp.f32 %v1786_v58 }
 0x630   :  { %v2994_v15 = vpop.eup %2993 }
 0x631   :  { %v2996_v18 = vpop.eup %2995  ;;  %v1792_v20 = vmul.f32 %v2994_v15, %v1790_v1 }
 0x632   :  { %v1799_v21 = vmul.f32 %v2996_v18, %v1797_v17  ;;  %v1795_v22 = vsub.f32 1.0, %v2996_v18 }
 0x633   :  { %v1793_v19 = vadd.f32 %v1792_v20, %v3251_v11 }
 0x635   :  { %2997 = vtanh.f32 %v1793_v19 }
 0x63f   :  { %v2998_v23 = vpop.eup %2997 }
 0x640   :  { %v1796_v24 = vmul.f32 %v2998_v23, %v1795_v22 }
 0x642   :  { %v1800_v25 = vadd.f32 %v1799_v21, %v1796_v24 }
 0x644   :  { %v1802_v26 = vrot.slane %v1800_v25, 2  ;;  %v2045_v53 = vrot.slane %v1800_v25, 6 }
 0x646   :  { %2768 = vmatmul.mubr.msk.f32.vlgmr.msra.gmra.mrb[18].mxu0 %vm329_vm2, %v1802_v26  ;;  %2775 = vmatmul.mubr.msk.f32.vlgmr.msra.gmra.mrb[24].mxu1 %vm329_vm2, %v1802_v26  ;;  %v1804_v27 = vadd.f32 %v1802_v26, %v1555_v56 }
 0x647   :  { %2922 = vmatpush3.bf16.msra.mxu0 %v3201_v47  ;;  %2781 = vmatprep.mubr.msk.f32.mxu0 %vm3044_vm1, %v3045_v41 }
 0x648   :  { %2926 = vmatprep.subr.bf16.mxu0 %v3043_v34  ;;  %2925 = vmatpush3.bf16.msra.mxu1 %v3155_v31 }
 0x649   :  { %2788 = vmatprep.mubr.msk.f32.mxu1 %vm3044_vm1, %v3045_v41  ;;  %2929 = vmatprep.subr.bf16.mxu1 %v3043_v34 }
 0x64a   :  { %2782 = vmatmul.mubr.msk.f32.vlgmr.msra.gmra.mrb[20].mxu0 %vm329_vm2, %v1802_v26 }
 0x64b   :  { %2928 = vmatpush3.bf16.msra.mxu0 %v3173_v38  ;;  %2795 = vmatprep.mubr.msk.f32.mxu0 %vm3044_vm1, %v3045_v41 }
 0x64c   :  { %2932 = vmatprep.subr.bf16.mxu0 %v3043_v34 }
 0x719   :  { %v1873_v29 = vpop.f32.mrb[18].mxu0  ;;  %v1943_v30 = vpop.f32.mrb[24].mxu1 }
 0x71a   :  { %v1874_v32 = vadd.f32 %v3233_v57, %v1873_v29  ;;  %v1944_v31 = vadd.f32 %v3241_v62, %v1943_v30  ;;  %v2769_v33 = vpop.f32.mrb[19].mxu0  ;;  %v2776_v35 = vpop.f32.mrb[25].mxu1 }
 0x71c   :  { %v2018_v36 = vrot.slane %v1874_v32, 4  ;;  %v2028_v37 = vrot.slane %v1944_v31, 4 }
 0x71d   :  { %v2013_v39 = vpop.f32.mrb[20].mxu0 }
 0x71e   :  { %v2020_v40 = vadd.f32 %v2018_v36, %v3228_v55  ;;  %v2030_v38 = vadd.f32 %v2028_v37, %v3226_v52  ;;  %v2783_v42 = vpop.f32.mrb[21].mxu0  ;;  %v2014_v49 = vadd.f32 %v3256_v16, %v2013_v39 }
 0x720   :  { %v2466_v43 = vmul.f32 -1.442695, %v2020_v40  ;;  %v2467_v44 = vmul.f32 -1.442695, %v2030_v38  ;;  %v2038_v50 = vrot.slane %v2014_v49, 4 }
 0x722   :  { %2999 = vpow2.f32 %v2466_v43 }
 0x723   :  { %3001 = vpow2.f32 %v2467_v44 }
 0x72c   :  { %v3000_v34 = vpop.eup %2999 }
 0x72d   :  { %v3002_v45 = vpop.eup %3001  ;;  %v2024_v46 = vadd.f32 1.0, %v3000_v34 }
 0x72e   :  { %v2034_v28 = vadd.f32 1.0, %v3002_v45 }
 0x72f   :  { %3003 = vrcp.f32 %v2024_v46 }
 0x730   :  { %3005 = vrcp.f32 %v2034_v28 }
 0x739   :  { %v3004_v51 = vpop.eup %3003 }
 0x73a   :  { %v3006_v54 = vpop.eup %3005  ;;  %v2040_v56 = vmul.f32 %v3004_v51, %v2038_v50 }
 0x73b   :  { %v2047_v48 = vmul.f32 %v3006_v54, %v2045_v53  ;;  %v2043_v60 = vsub.f32 1.0, %v3006_v54 }
 0x73c   :  { %v2041_v59 = vadd.f32 %v2040_v56, %v3251_v11 }
 0x73e   :  { %3007 = vtanh.f32 %v2041_v59 }
 0x748   :  { %v3008_v61 = vpop.eup %3007 }
 0x749   :  { %v2044_v63 = vmul.f32 %v3008_v61, %v2043_v60 }
 0x74b   :  { %v2048_v0 = vadd.f32 %v2047_v48, %v2044_v63 }
 0x74d   :  { %v2050_v2 = vrot.slane %v2048_v0, 4  ;;  %v2293_v24 = vrot.slane %v2048_v0, 6 }
 0x74f   :  { %2789 = vmatmul.mubr.msk.f32.vlgmr.msra.gmra.mrb[26].mxu1 %vm329_vm2, %v2050_v2  ;;  %2796 = vmatmul.mubr.msk.f32.vlgmr.msra.gmra.mrb[22].mxu0 %vm329_vm2, %v2050_v2  ;;  %v2052_v3 = vadd.f32 %v2050_v2, %v1804_v27 }
 0x750   :  { %2931 = vmatpush3.bf16.msra.mxu1 %v3201_v47  ;;  %2802 = vmatprep.mubr.msk.f32.mxu1 %vm3044_vm1, %v3045_v41 }
 0x751   :  { %2809 = vmatprep.mubr.msk.f32.mxu0 %vm3044_vm1, %v3045_v41  ;;  %2934 = vmatpush3.bf16.msra.mxu0 %v2933_v6 }
 0x753   :  { %2803 = vmatmul.mubr.msk.f32.vlgmr.msra.gmra.mrb[28].mxu1 %vm329_vm2, %v2050_v2 }
 0x822   :  { %v2121_v7 = vpop.f32.mrb[26].mxu1  ;;  %v2191_v47 = vpop.f32.mrb[22].mxu0 }
 0x823   :  { %v2122_v8 = vadd.f32 %v3233_v57, %v2121_v7  ;;  %v2192_v9 = vadd.f32 %v3241_v62, %v2191_v47  ;;  %v2790_v10 = vpop.f32.mrb[27].mxu1  ;;  %v2797_v41 = vpop.f32.mrb[23].mxu0 }
 0x825   :  { %v2266_v12 = vrot.slane %v2122_v8, 2  ;;  %v2276_v13 = vrot.slane %v2192_v9, 2 }
 0x826   :  { %v2261_v58 = vpop.f32.mrb[28].mxu1 }
 0x827   :  { %v2268_v14 = vadd.f32 %v2266_v12, %v3228_v55  ;;  %v2278_v1 = vadd.f32 %v2276_v13, %v3226_v52  ;;  %v2804_v15 = vpop.f32.mrb[29].mxu1  ;;  %v2262_v62 = vadd.f32 %v3256_v16, %v2261_v58  ;;  %v2473_v16 = vld [vmem:[%s3440_s6] ss:$0 sm:$0xff] }
 0x829   :  { %v2471_v17 = vmul.f32 -1.442695, %v2268_v14  ;;  %v2472_v18 = vmul.f32 -1.442695, %v2278_v1  ;;  %v2286_v22 = vrot.slane %v2262_v62, 2 }
 0x82b   :  { %3009 = vpow2.f32 %v2471_v17 }
 0x82c   :  { %3011 = vpow2.f32 %v2472_v18 }
 0x835   :  { %v3010_v20 = vpop.eup %3009 }
 0x836   :  { %v3012_v21 = vpop.eup %3011  ;;  %v2272_v19 = vadd.f32 1.0, %v3010_v20 }
 0x837   :  { %v2282_v57 = vadd.f32 1.0, %v3012_v21 }
 0x838   :  { %3013 = vrcp.f32 %v2272_v19 }
 0x839   :  { %3015 = vrcp.f32 %v2282_v57 }
 0x842   :  { %v3014_v23 = vpop.eup %3013 }
 0x843   :  { %v3016_v25 = vpop.eup %3015  ;;  %v2288_v55 = vmul.f32 %v3014_v23, %v2286_v22 }
 0x844   :  { %v2295_v26 = vmul.f32 %v3016_v25, %v2293_v24  ;;  %v2291_v27 = vsub.f32 1.0, %v3016_v25 }
 0x845   :  { %v2289_v52 = vadd.f32 %v2288_v55, %v3251_v11 }
 0x847   :  { %3017 = vtanh.f32 %v2289_v52 }
 0x851   :  { %v3018_v29 = vpop.eup %3017 }
 0x852   :  { %v2292_v30 = vmul.f32 %v3018_v29, %v2291_v27 }
 0x854   :  { %v2296_v32 = vadd.f32 %v2295_v26, %v2292_v30 }
 0x856   :  { %v2298_v31 = vrot.slane %v2296_v32, 6 }
 0x858   :  { %v2300_v33 = vadd.f32 %v2298_v31, %v2052_v3 }
 0x85a   :  { %v2301_v35 = vmul.f32 0.125, %v2300_v33 }
 0x85c   :  { %2810 = vmatmul.mubr.msk.f32.vlgmr.msra.gmra.mrb[24].mxu0 %vm329_vm2, %v2301_v35 }
 0x92f   :  { %v2380_v36 = vpop.f32.mrb[24].mxu0 }
 0x930   :  { %v2381_v37 = vadd.f32 %v2473_v16, %v2380_v36  ;;  %v2811_v11 = vpop.f32.mrb[25].mxu0 }
 0x932   :  { %2385 = vst.msk [vmem:[#allocation2] sm:$0x3] %vm2384_vm3, %v2381_v37 }
 0x933   :  { %3030 = shalt.err (!%p3027_p4)
}
 0x934   :  { %s3031_s12 = scalar_lea.hbm %s3441_s7, 32 }
 0x935   :  { %p3032_p5 = scmp.ne.s32.totalorder %s3441_s7, %s3031_s12  ;;  %p3035_p6 = scmp.lt.u32.totalorder %s3031_s12, %s3441_s7 }
 0x937   :  { %p3037_p7 = pnand %p3035_p6, %p3032_p5 }
 0x939   :  { %3040 = shalt.err (!%p3037_p7)
}
 0x93a   :  { %2395 = dma.vmem_to_hbm [thread:$0]  %s2393_s8, 32, %s3441_s7, [#allocation3]  }
 0x93b   :  { %3041 = dma.done.wait [#allocation3], 32  }
 0x93c   :  { %3042 = vsyncadd [#allocation3], 4294967264 }
 0x93d   :  { %2399 = vsyncpa [#allocation3], 1 }

</bundles_post_ra>
